<compile_context>
chip_gen: v7x
topology: tpu7x:2x2x1
jax: 0.10.0
libtpu: 0.0.40
codegen_flags: <defaults>
</compile_context>

<pallas_src>
import functools
from typing import NamedTuple, Tuple

import jax
import jax.numpy as jnp
from jax.experimental import pallas as pl
from jax.experimental.pallas import tpu as pltpu

LANES = 128
SUBLANES = 8


def _round_up(x, m):
    return (x + m - 1) // m * m


# ---------------------------------------------------------------------------
# Activations
# ---------------------------------------------------------------------------
def _apply_activation(y, name, negative_slope=0.01):
    if name == 'Sigmoid':
        # sigmoid(y) == 0.5*(tanh(y/2)+1): one EUP tanh instead of exp+divide.
        return 0.5 * (jnp.tanh(0.5 * y) + 1.0)
    if name == 'ReLU':
        return jnp.maximum(y, 0.0)
    if name == 'ReLU6':
        return jnp.clip(y, 0.0, 6.0)
    if name == 'LeakyReLU':
        return jnp.where(y > 0, y, negative_slope * y)
    if name == 'Tanh':
        return jnp.tanh(y)
    if name == 'None':
        return y
    raise ValueError(f"unsupported activation: {name}")


def _apply_activation_ref(y, name, negative_slope=0.01):
    # Reference path mirrors torch exactly (true sigmoid).
    if name == 'Sigmoid':
        return jax.nn.sigmoid(y)
    return _apply_activation(y, name, negative_slope)


# ---------------------------------------------------------------------------
# Static layout description of the packed parameter / output slabs
# ---------------------------------------------------------------------------
class EDLALayout(NamedTuple):
    input_size: int
    layer_kn: Tuple[Tuple[int, int], ...]   # per layer (K, N) of the folded matmul
    col_off: Tuple[int, ...]                # 128-aligned column offset per layer
    bias_row: int                           # row holding combined biases
    lastw_row: int                          # row holding transposed last-layer weight
    vpu_last: bool                          # last layer uses VPU reduce (N_last == 1)
    out_off: Tuple[int, ...]                # output segments: [cat_x, pre_0..pre_{L-1}, final]
    out_width: int                          # padded output slab width


# ---------------------------------------------------------------------------
# One-time parameter packing (hoisted out of the hot path)
# ---------------------------------------------------------------------------
def prepare_edla_params(params):
    """Fold + pack all layer parameters into ONE padded f32 slab.

    layer 0 : both halves of cat([x, x]) are identical, so
              fc_p + fc_n == x @ (Wp.T + Wn.T) + (bp + bn)
    layer>=1: split-input double linear == h @ [Wp.T ; Wn.T] + (bp + bn)

    Slab rows: [0, K_max) folded weights, bias_row combined biases,
    lastw_row the last layer's weight stored as a row (VPU path).
    Column blocks are 128-lane aligned; row blocks 8-sublane aligned.
    """
    num_layers = len(params)
    ws, bs = [], []
    for l, p in enumerate(params):
        wp_t = jnp.transpose(jnp.asarray(p['wp'], jnp.float32))
        wn_t = jnp.transpose(jnp.asarray(p['wn'], jnp.float32))
        w = wp_t + wn_t if l == 0 else jnp.concatenate([wp_t, wn_t], axis=0)
        b = (jnp.asarray(p['bp'], jnp.float32)
             + jnp.asarray(p['bn'], jnp.float32)).reshape(1, -1)
        ws.append(w)
        bs.append(b)

    layer_kn = tuple((int(w.shape[0]), int(w.shape[1])) for w in ws)
    K_last, N_last = layer_kn[-1]
    vpu_last = (N_last == 1)

    col_off, c = [], 0
    for l, (K, N) in enumerate(layer_kn):
        col_off.append(c)
        width = N
        if l == num_layers - 1 and vpu_last:
            width = max(width, K)           # block also holds the (1, K) weight row
        c += _round_up(max(width, 1), LANES)
    total_cols = c

    K_max = max(K for K, _ in layer_kn)
    bias_row = _round_up(K_max, SUBLANES)
    lastw_row = bias_row + SUBLANES
    total_rows = lastw_row + SUBLANES

    slab = jnp.zeros((total_rows, total_cols), jnp.float32)
    for l, (w, b) in enumerate(zip(ws, bs)):
        K, N = layer_kn[l]
        slab = slab.at[:K, col_off[l]:col_off[l] + N].set(w)
        slab = slab.at[bias_row, col_off[l]:col_off[l] + N].set(b[0])
    if vpu_last:
        slab = slab.at[lastw_row, col_off[-1]:col_off[-1] + K_last].set(ws[-1][:, 0])

    # Output slab segments, each 128-lane aligned so every in-kernel store is
    # an aligned sub-block store.
    input_size = int(params[0]['wp'].shape[1])
    out_off, o = [], 0
    out_off.append(o)
    o += _round_up(2 * input_size, LANES)           # cat([x, x])
    for _, N in layer_kn:
        out_off.append(o)
        o += _round_up(N, LANES)                    # pre-activation of layer l
    out_off.append(o)
    o += _round_up(N_last, LANES)                   # final activated output

    layout = EDLALayout(input_size=input_size, layer_kn=layer_kn,
                        col_off=tuple(col_off), bias_row=bias_row,
                        lastw_row=lastw_row, vpu_last=vpu_last,
                        out_off=tuple(out_off), out_width=o)
    return slab, layout


# ---------------------------------------------------------------------------
# Fused Pallas kernel: all EDLayers + activations, one packed output slab
# ---------------------------------------------------------------------------
def fused_edla_kernel(x_ref, p_ref, out_ref, *, layout, layer_acts):
    L = len(layout.layer_kn)
    in_sz = layout.input_size
    x = x_ref[...]                                   # (B, input_size)

    # One dense store defines the padded lanes; segment stores overwrite below.
    out_ref[...] = jnp.zeros_like(out_ref)

    # outputs[0] = torch.cat([x, x], dim=1): two static-lane-range stores.
    o0 = layout.out_off[0]
    out_ref[:, o0:o0 + in_sz] = x
    out_ref[:, o0 + in_sz:o0 + 2 * in_sz] = x

    h = x
    for l in range(L):                               # unrolled at trace time
        K, N = layout.layer_kn[l]
        c0 = layout.col_off[l]
        b = p_ref[layout.bias_row:layout.bias_row + 1, c0:c0 + N]        # (1, N)
        if l == L - 1 and layout.vpu_last:
            # N == 1: VPU multiply + lane reduce instead of a 1-column MXU matmul.
            w_row = p_ref[layout.lastw_row:layout.lastw_row + 1, c0:c0 + K]   # (1, K)
            pre = jnp.sum(h * w_row, axis=-1, keepdims=True) + b
        else:
            w = p_ref[0:K, c0:c0 + N]                                    # (K, N)
            pre = jnp.dot(h, w, preferred_element_type=jnp.float32) + b
        oo = layout.out_off[1 + l]
        out_ref[:, oo:oo + N] = pre                  # pre-activation (needed by update())
        h = _apply_activation(pre, layer_acts[l])

    of = layout.out_off[1 + L]
    N_last = layout.layer_kn[-1][1]
    out_ref[:, of:of + N_last] = h                   # final activated output


# ---------------------------------------------------------------------------
# EDLA.forward : returns (final activated output, list of pre-activations)
# ---------------------------------------------------------------------------
@functools.partial(jax.jit,
                   static_argnames=('layout', 'activation_fn', 'last_activation_fn'))
def edla_forward(param_slab, x, layout, activation_fn='Sigmoid',
                 last_activation_fn='Sigmoid'):
    L = len(layout.layer_kn)
    layer_acts = tuple([activation_fn] * (L - 1) + [last_activation_fn])
    B = x.shape[0]
    vmem = pl.BlockSpec(memory_space=pltpu.MemorySpace.VMEM)

    slab = pl.pallas_call(
        functools.partial(fused_edla_kernel, layout=layout, layer_acts=layer_acts),
        out_shape=jax.ShapeDtypeStruct((B, layout.out_width), jnp.float32),
        in_specs=[vmem, vmem],
        out_specs=vmem,
    )(x, param_slab)

    o = layout.out_off
    cat_x = slab[:, o[0]:o[0] + 2 * layout.input_size]
    pres = [slab[:, o[1 + l]:o[1 + l] + layout.layer_kn[l][1]] for l in range(L)]
    final = slab[:, o[1 + L]:o[1 + L] + layout.layer_kn[-1][1]]
    return final, [cat_x] + pres

# TODO(synk): EDLA.update / update_core (training-time weight-diffusion step)
# is not part of forward() and is left unimplemented.


# ---------------------------------------------------------------------------
# Deterministic parameter init, mirroring EDLayer.initialize_weights()
# ---------------------------------------------------------------------------
def init_edlayer(key, input_size, output_size, last_layer=False):
    out_dim = output_size if last_layer else output_size * 2
    k1, k2, k3, k4 = jax.random.split(key, 4)
    wp = jax.random.uniform(k1, (out_dim, input_size),
                            minval=-1.0, maxval=0.0, dtype=jnp.float32)
    bp = jax.random.uniform(k2, (out_dim,),
                            minval=-1.0, maxval=0.0, dtype=jnp.float32)
    wp = wp.at[:output_size, :].multiply(-1.0)
    bp = bp.at[:output_size].multiply(-1.0)
    wn = jax.random.uniform(k3, (out_dim, input_size),
                            minval=0.0, maxval=1.0, dtype=jnp.float32)
    bn = jax.random.uniform(k4, (out_dim,),
                            minval=0.0, maxval=1.0, dtype=jnp.float32)
    wn = wn.at[:output_size, :].multiply(-1.0)
    bn = bn.at[:output_size].multiply(-1.0)
    return dict(wp=wp, bp=bp, wn=wn, bn=bn)


def init_edla(key, input_size, hidden_size, output_size, hidden_layers=1):
    keys = jax.random.split(key, hidden_layers + 1 if hidden_layers != 0 else 1)
    params = []
    if hidden_layers != 0:
        params.append(init_edlayer(keys[0], input_size, hidden_size))
        for i in range(hidden_layers - 1):
            params.append(init_edlayer(keys[1 + i], hidden_size, hidden_size))
        params.append(init_edlayer(keys[-1], hidden_size, output_size,
                                   last_layer=True))
    else:
        params.append(init_edlayer(keys[0], input_size, output_size,
                                   last_layer=True))
    return params


# ---------------------------------------------------------------------------
# Pure-JAX reference (mirrors the PyTorch forward) for a correctness check
# ---------------------------------------------------------------------------
def edla_forward_ref(params, x, activation_fn='Sigmoid',
                     last_activation_fn='Sigmoid'):
    num_layers = len(params)
    activation_fns = (['None'] + [activation_fn] * (num_layers - 1)
                      + [last_activation_fn])
    x = jnp.concatenate([x, x], axis=1)
    outputs = [x]
    x = _apply_activation_ref(x, activation_fns[0])
    for l, p in enumerate(params):
        _, M = x.shape
        Mh = M // 2
        pre = (x[:, :Mh] @ p['wp'].T + p['bp']) + (x[:, Mh:] @ p['wn'].T + p['bn'])
        outputs.append(pre)
        x = _apply_activation_ref(pre, activation_fns[l + 1])
    return x, outputs


if __name__ == "__main__":
    # batch=8, input=16, hidden=32, output=1 (recommended), one hidden layer.
    B, INPUT, HIDDEN, OUTPUT, HLAYERS = 8, 16, 32, 1, 1

    key = jax.random.PRNGKey(0)
    kx, kp = jax.random.split(key)
    x = jax.random.normal(kx, (B, INPUT), dtype=jnp.float32)
    params = init_edla(kp, INPUT, HIDDEN, OUTPUT, hidden_layers=HLAYERS)
    slab, layout = prepare_edla_params(params)       # one-time packing

    y, outputs = edla_forward(slab, x, layout)
    y = jax.block_until_ready(y)
    outputs = jax.block_until_ready(outputs)

    # Verify against pure-JAX reference of the PyTorch semantics.
    # (Not bit-exact: layer-0 fold reorders sums, sigmoid uses tanh form.)
    y_ref, outputs_ref = edla_forward_ref(params, x)
    assert y.shape == (B, OUTPUT)
    assert len(outputs) == len(outputs_ref) == HLAYERS + 2
    assert jnp.allclose(y, y_ref, atol=1e-4, rtol=1e-4)
    for o, o_ref in zip(outputs, outputs_ref):
        assert o.shape == o_ref.shape
        assert jnp.allclose(o, o_ref, atol=1e-4, rtol=1e-4)

    # Second config: 2 hidden layers (3 EDLayers), ReLU hidden activations.
    params2 = init_edla(jax.random.PRNGKey(3), INPUT, HIDDEN, OUTPUT,
                        hidden_layers=2)
    slab2, layout2 = prepare_edla_params(params2)
    y2, outs2 = edla_forward(slab2, x, layout2, activation_fn='ReLU',
                             last_activation_fn='Sigmoid')
    y2 = jax.block_until_ready(y2)
    y2_ref, outs2_ref = edla_forward_ref(params2, x, activation_fn='ReLU',
                                         last_activation_fn='Sigmoid')
    assert jnp.allclose(y2, y2_ref, atol=1e-4, rtol=1e-4)
    assert len(outs2) == len(outs2_ref)
    for o, o_ref in zip(outs2, outs2_ref):
        assert o.shape == o_ref.shape
        assert jnp.allclose(o, o_ref, atol=1e-4, rtol=1e-4)

    print("KERNEL_OK")
</pallas_src>

<mosaic_0001>
module attributes {stable_mosaic.version = 11 : i64} {
  func.func @fused_edla_kernel(%arg0: memref<8x16xf32, #tpu.memory_space<vmem>>, %arg1: memref<80x256xf32, #tpu.memory_space<vmem>>, %arg2: memref<8x512xf32, #tpu.memory_space<vmem>>) attributes {dimension_semantics = [], scalar_prefetch = 0 : i64, scratch_operands = 0 : i64, tpu.core_type = #tpu.core_type<tc>} {
    %c0 = arith.constant 0 : index
    %c0_0 = arith.constant 0 : index
    %0 = vector.load %arg0[%c0, %c0_0] : memref<8x16xf32, #tpu.memory_space<vmem>>, vector<8x16xf32>
    %cst = arith.constant 0.000000e+00 : f32
    %1 = vector.broadcast %cst : f32 to vector<8x512xf32>
    %c0_1 = arith.constant 0 : index
    %c0_2 = arith.constant 0 : index
    %2 = vector.load %arg2[%c0_1, %c0_2] : memref<8x512xf32, #tpu.memory_space<vmem>>, vector<8x512xf32>
    tpu.vector_store %arg2[%c0_1, %c0_2], %1 {strides = array<i32>} : memref<8x512xf32, #tpu.memory_space<vmem>>, vector<8x512xf32>,
    %c0_3 = arith.constant 0 : index
    %c0_4 = arith.constant 0 : index
    %3 = vector.load %arg2[%c0_3, %c0_4] : memref<8x512xf32, #tpu.memory_space<vmem>>, vector<8x16xf32>
    tpu.vector_store %arg2[%c0_3, %c0_4], %0 {strides = array<i32>} : memref<8x512xf32, #tpu.memory_space<vmem>>, vector<8x16xf32>,
    %c0_5 = arith.constant 0 : index
    %c16 = arith.constant 16 : index
    %4 = vector.load %arg2[%c0_5, %c16] : memref<8x512xf32, #tpu.memory_space<vmem>>, vector<8x16xf32>
    tpu.vector_store %arg2[%c0_5, %c16], %0 {strides = array<i32>} : memref<8x512xf32, #tpu.memory_space<vmem>>, vector<8x16xf32>,
    %c64 = arith.constant 64 : index
    %c0_6 = arith.constant 0 : index
    %5 = vector.load %arg1[%c64, %c0_6] : memref<80x256xf32, #tpu.memory_space<vmem>>, vector<1x64xf32>
    %c0_7 = arith.constant 0 : index
    %c0_8 = arith.constant 0 : index
    %6 = vector.load %arg1[%c0_7, %c0_8] : memref<80x256xf32, #tpu.memory_space<vmem>>, vector<16x64xf32>
    %cst_9 = arith.constant dense<0.000000e+00> : vector<8x64xf32>
    %7 = tpu.matmul %0, %6, %cst_9 {dimension_numbers = #tpu.dot_dimension_numbers<[1], [0], [0], [1], [0, 0, 1, 1], [], []>} : vector<8x16xf32>, vector<16x64xf32>, vector<8x64xf32> -> vector<8x64xf32>
    %8 = vector.broadcast %5 : vector<1x64xf32> to vector<8x64xf32>
    %9 = arith.addf %7, %8 : vector<8x64xf32>
    %c0_10 = arith.constant 0 : index
    %c128 = arith.constant 128 : index
    %10 = vector.load %arg2[%c0_10, %c128] : memref<8x512xf32, #tpu.memory_space<vmem>>, vector<8x64xf32>
    tpu.vector_store %arg2[%c0_10, %c128], %9 {strides = array<i32>} : memref<8x512xf32, #tpu.memory_space<vmem>>, vector<8x64xf32>,
    %cst_11 = arith.constant 5.000000e-01 : f32
    %11 = vector.broadcast %cst_11 : f32 to vector<8x64xf32>
    %12 = arith.mulf %11, %9 : vector<8x64xf32>
    %13 = math.tanh %12 : vector<8x64xf32>
    %cst_12 = arith.constant 1.000000e+00 : f32
    %14 = vector.broadcast %cst_12 : f32 to vector<8x64xf32>
    %15 = arith.addf %13, %14 : vector<8x64xf32>
    %cst_13 = arith.constant 5.000000e-01 : f32
    %16 = vector.broadcast %cst_13 : f32 to vector<8x64xf32>
    %17 = arith.mulf %16, %15 : vector<8x64xf32>
    %c64_14 = arith.constant 64 : index
    %c128_15 = arith.constant 128 : index
    %18 = vector.load %arg1[%c64_14, %c128_15] : memref<80x256xf32, #tpu.memory_space<vmem>>, vector<1x1xf32>
    %c72 = arith.constant 72 : index
    %c128_16 = arith.constant 128 : index
    %19 = vector.load %arg1[%c72, %c128_16] : memref<80x256xf32, #tpu.memory_space<vmem>>, vector<1x64xf32>
    %20 = vector.broadcast %19 : vector<1x64xf32> to vector<8x64xf32>
    %21 = arith.mulf %17, %20 : vector<8x64xf32>
    %cst_17 = arith.constant dense<0.000000e+00> : vector<8xf32>
    %22 = vector.multi_reduction <add>, %21, %cst_17 [1] : vector<8x64xf32> to vector<8xf32>
    %23 = vector.shape_cast %22 : vector<8xf32> to vector<8x1xf32>
    %24 = vector.broadcast %18 : vector<1x1xf32> to vector<8x1xf32>
    %25 = arith.addf %23, %24 : vector<8x1xf32>
    %c0_18 = arith.constant 0 : index
    %c256 = arith.constant 256 : index
    %26 = vector.load %arg2[%c0_18, %c256] : memref<8x512xf32, #tpu.memory_space<vmem>>, vector<8x1xf32>
    tpu.vector_store %arg2[%c0_18, %c256], %25 {strides = array<i32>} : memref<8x512xf32, #tpu.memory_space<vmem>>, vector<8x1xf32>,
    %cst_19 = arith.constant 5.000000e-01 : f32
    %27 = vector.broadcast %cst_19 : f32 to vector<8x1xf32>
    %28 = arith.mulf %27, %25 : vector<8x1xf32>
    %29 = math.tanh %28 : vector<8x1xf32>
    %cst_20 = arith.constant 1.000000e+00 : f32
    %30 = vector.broadcast %cst_20 : f32 to vector<8x1xf32>
    %31 = arith.addf %29, %30 : vector<8x1xf32>
    %cst_21 = arith.constant 5.000000e-01 : f32
    %32 = vector.broadcast %cst_21 : f32 to vector<8x1xf32>
    %33 = arith.mulf %32, %31 : vector<8x1xf32>
    %c0_22 = arith.constant 0 : index
    %c384 = arith.constant 384 : index
    %34 = vector.load %arg2[%c0_22, %c384] : memref<8x512xf32, #tpu.memory_space<vmem>>, vector<8x1xf32>
    tpu.vector_store %arg2[%c0_22, %c384], %33 {strides = array<i32>} : memref<8x512xf32, #tpu.memory_space<vmem>>, vector<8x1xf32>,
    return
  }
}

</mosaic_0001>

<bundles_post_ra>
// kernel: edla_forward.1
= control target key start
LH: loop header
LB: loop body
LE: loop exit
PB: predicated region body
PF: predicated region fallthrough
CT: control target
= control target key end

     0   :  { %7 = vsyncpa [#allocation3], 0  ;;  %s306_s0 = inlined_call_operand.hbm [shape: f32[8,16], index: 0, kind: input, shape index: {}]   ;;  %s307_s1 = inlined_call_operand.hbm [shape: f32[80,256], index: 1, kind: input, shape index: {}]   ;;  %s308_s2 = inlined_call_operand.vmem [shape: f32[8,512], index: 2, kind: output, shape index: {}]  }
   0x1   :  { %8 = vsyncpa [#allocation5], 0  ;;  %s224_s9 = smov [#allocation2]   ;;  %s225_s11 = smov [#allocation4]  }
   0x2   :  { %s15_s10 = sshll.u32 %s224_s9, 4  ;;  %s24_s12 = sshll.u32 %s225_s11, 4  ;;  %s16_s10 = int_to_ptr.vmem [resolvable:$true] %s15_s10  ;;  %s246_s12 = int_to_ptr.vmem [resolvable:$true] %s24_s12 }
   0x3   :  { %s176_s15 = scalar_lea.hbm %s306_s0, 128 }
   0x4   :  { %p177_p0 = scmp.ne.s32.totalorder %s306_s0, %s176_s15  ;;  %p180_p1 = scmp.lt.u32.totalorder %s176_s15, %s306_s0 }
   0x6   :  { %p182_p2 = pnand %p180_p1, %p177_p0 }
   0x8   :  { %185 = shalt.err (!%p182_p2)
}
   0x9   :  { %s186_s20 = scalar_lea.vmem %s16_s10, 128  ;;  %p191_p4 = scmp.lt.s32.totalorder %s16_s10, %s16_s10 }
   0xa   :  { %p187_p3 = scmp.ne.s32.totalorder %s16_s10, %s186_s20  ;;  %p192_p5 = scmp.lt.s32.totalorder %s186_s20, %s186_s20 }
   0xc   :  { %p193_p6 = por %p192_p5, %p191_p4 }
   0xe   :  { %p194_p7 = pnand %p193_p6, %p187_p3 }
  0x10   :  { %197 = shalt.err (!%p194_p7)
}
  0x11   :  { %18 = dma.hbm_to_vmem [thread:$0]  %s306_s0, 128, %s16_s10, [#allocation3]  }
  0x12   :  { %s198_s25 = scalar_lea.hbm %s307_s1, 2560 }
  0x13   :  { %p199_p8 = scmp.ne.s32.totalorder %s307_s1, %s198_s25  ;;  %p202_p9 = scmp.lt.u32.totalorder %s198_s25, %s307_s1 }
  0x15   :  { %p204_p10 = pnand %p202_p9, %p199_p8 }
  0x17   :  { %207 = shalt.err (!%p204_p10)
}
  0x18   :  { %s208_s30 = scalar_lea.vmem %s246_s12, 2560  ;;  %p213_p12 = scmp.lt.s32.totalorder %s246_s12, %s246_s12 }
  0x19   :  { %p209_p11 = scmp.ne.s32.totalorder %s246_s12, %s208_s30  ;;  %p214_p13 = scmp.lt.s32.totalorder %s208_s30, %s208_s30 }
  0x1b   :  { %p215_p0 = por %p214_p13, %p213_p12 }
  0x1d   :  { %p216_p1 = pnand %p215_p0, %p209_p11 }
  0x1f   :  { %219 = shalt.err (!%p216_p1)
}
  0x20   :  { %s226_s0 = smov 256   ;;  %s227_s3 = smov 16  }
  0x21   :  { %30 = dma.hbm_to_vmem [thread:$0]  %s307_s1, 2560, %s246_s12, [#allocation5], %s226_s0, %s226_s0, %s227_s3  }
  0x22   :  { %220 = dma.done.wait [#allocation3], 128  }
  0x23   :  { %221 = vsyncadd [#allocation3], 4294967168 }
  0x24   :  { %222 = dma.done.wait [#allocation5], 2560  }
  0x25   :  { %223 = vsyncadd [#allocation5], 4294964736  ;;  %v228_v0 = vmov 0.0|0.0   ;;  %v229_v1 = vmov 0.0   ;;  %vm230_vm0 = vmmov 0   ;;  %v51_v2 = vld [vmem:[#allocation4] sm:$0xff] }
  0x26   :  { %162 = vmatprep.subr.bf16.mxu0 %v228_v0  ;;  %40 = vst [vmem:[%s308_s2 + $0x10] sm:$0xff] %v229_v1  ;;  %41 = vst [vmem:[%s308_s2 + $0x18] sm:$0xff] %v229_v1  ;;  %159 = vmatprep.mubr.msk.f32.mxu0 %vm230_vm0, %v229_v1  ;;  %v52_v3 = vld [vmem:[#allocation4 + $0x10] sm:$0xff]  ;;  %v37_v4 = vld [vmem:[#allocation2] sm:$0xff]  ;;  %vm42_vm1 = vcmask 130048   ;;  %vm125_vm2 = vcmask 523264  }
  0x27   :  { %38 = vst [vmem:[%s308_s2] sm:$0xff] %v229_v1  ;;  %39 = vst [vmem:[%s308_s2 + $0x8] sm:$0xff] %v229_v1  ;;  %v163_v5 = vpack.c.bf16 %v52_v3, %v51_v2  ;;  %v50_v6 = vld [vmem:[#allocation4 + $0x80] ss:$0 sm:$0xff]  ;;  %v132_v13 = vld [vmem:[#allocation4 + $0x98] ss:$0 sm:$0xff]  ;;  %vm138_vm3 = vcmask 7168  }
  0x28   :  { %43 = vst.msk [vmem:[%s308_s2] sm:$0xff] %vm42_vm1, %v37_v4  ;;  %v131_v17 = vld [vmem:[#allocation4 + $0x88] ss:$0 sm:$0xff]  ;;  %vm48_vm4 = vcmask 261248  }
  0x29   :  { %164 = vmatpush3.bf16.msra.mxu0 %v163_v5 }
  0x2c   :  { %160 = vmatmul.mubr.msk.f32.vlgmr.msra.gmra.mrb[0].mxu0 %vm42_vm1, %v37_v4 }
  0xff   :  { %v121_v7 = vpop.f32.mrb[0].mxu0 }
 0x100   :  { %v122_v8 = vadd.f32 %v121_v7, %v50_v6  ;;  %v161_v9 = vpop.f32.mrb[1].mxu0 }
 0x102   :  { %v127_v10 = vmul.f32 0.5, %v122_v8  ;;  %126 = vst.msk [vmem:[%s308_s2 + $0x8] sm:$0xff] %vm125_vm2, %v122_v8 }
 0x104   :  { %172 = vtanh.f32 %v127_v10 }
 0x10e   :  { %v173_v11 = vpop.eup %172 }
 0x10f   :  { %v129_v12 = vadd.f32 1.0, %v173_v11 }
 0x111   :  { %v130_v14 = vmul.f32 0.5, %v129_v12 }
 0x113   :  { %v133_v15 = vmul.f32 %v132_v13, %v130_v14 }
 0x115   :  { %v134_v16 = vsel %vm125_vm2, %v133_v15, 0.0 }
 0x116   :  { %135 = vadd.xlane.f32.xlu0 %v134_v16 }
 0x12c   :  { %45 = vrot.lane.b32.xlu0 %v37_v4, %s227_s3 }
 0x1a3   :  { %v136_v18 = vpop.xlane.xlu0 %135 }
 0x1a4   :  { %v137_v19 = vadd.f32 %v136_v18, %v131_v17 }
 0x1a6   :  { %139 = vst.msk [vmem:[%s308_s2 + $0x10] sm:$0xff] %vm138_vm3, %v137_v19  ;;  %v140_v20 = vmul.f32 0.5, %v137_v19 }
 0x1a7   :  { %v46_v21 = vpop.permute.xlu0 %45 }
 0x1a8   :  { %174 = vtanh.f32 %v140_v20  ;;  %49 = vst.msk [vmem:[%s308_s2] sm:$0xff] %vm48_vm4, %v46_v21 }
 0x1b2   :  { %v175_v22 = vpop.eup %174 }
 0x1b3   :  { %v142_v23 = vadd.f32 1.0, %v175_v22 }
 0x1b5   :  { %v143_v24 = vmul.f32 0.5, %v142_v23 }
 0x1b7   :  { %144 = vst.msk [vmem:[%s308_s2 + $0x18] sm:$0xff] %vm138_vm3, %v143_v24 }
 0x1b8   :  { %149 = vsyncpa [#allocation3], 1 }
 0x1b9   :  { %150 = vsyncpa [#allocation5], 1 }

</bundles_post_ra>
